<compile_context>
chip_gen: v7x
topology: tpu7x:2x2x1
jax: 0.10.0
libtpu: 0.0.40
codegen_flags: <defaults>
</compile_context>

<pallas_src>
import jax
import jax.numpy as jnp
from jax.experimental import pallas as pl
from jax.experimental.pallas import tpu as pltpu


# ----------------------------------------------------------------------------
# Kernels
# ----------------------------------------------------------------------------
def _gate(alpha_f32, gnn, out_ref):
    # Gating multiply: stay in the (bf16-capable) activation dtype when the
    # output is sub-f32 (halves vreg/store traffic on v6e/v7x); keep the f32
    # path for f32 activations.
    if out_ref.dtype == jnp.float32:
        out_ref[...] = alpha_f32 * gnn.astype(jnp.float32)
    else:
        out_ref[...] = alpha_f32.astype(out_ref.dtype) * gnn


def gate_kernel_resident(bert_ref, gnn_ref, wb_ref, wg_ref, b_ref, out_ref):
    """Grid: (batch tiles,).  Weights/bias fully VMEM-resident."""
    gnn = gnn_ref[...]
    z = jnp.dot(bert_ref[...], wb_ref[...], preferred_element_type=jnp.float32)
    z = z + jnp.dot(gnn, wg_ref[...], preferred_element_type=jnp.float32)
    alpha = jax.nn.sigmoid(z + b_ref[...])
    _gate(alpha, gnn, out_ref)


def gate_kernel_ntiled(bert_ref, gnn_k_ref, gnn_n_ref, wb_ref, wg_ref, b_ref,
                       out_ref):
    """Grid: (batch tiles, feature tiles).  Weights stream along the N axis."""
    z = jnp.dot(bert_ref[...], wb_ref[...], preferred_element_type=jnp.float32)
    z = z + jnp.dot(gnn_k_ref[...], wg_ref[...], preferred_element_type=jnp.float32)
    alpha = jax.nn.sigmoid(z + b_ref[...])
    _gate(alpha, gnn_n_ref[...], out_ref)


# ----------------------------------------------------------------------------
# One-time parameter prep (model-load time, NOT per forward call)
# ----------------------------------------------------------------------------
def prepare_gate_params(wb, bb, wg, bg, weight_dtype=None):
    # (out, in) -> (in, out): kernel then runs a standard (M,K)x(K,N) MXU
    # contraction with no per-step weight relayout.
    wb_t = jnp.asarray(wb).T
    wg_t = jnp.asarray(wg).T
    if weight_dtype is not None:
        # e.g. jnp.bfloat16 on v6e/v7x: halves HBM weight traffic and VMEM
        # residency (kernel keeps preferred_element_type=float32).
        wb_t = wb_t.astype(weight_dtype)
        wg_t = wg_t.astype(weight_dtype)
    b_fused = (bb.astype(jnp.float32) + bg.astype(jnp.float32)).reshape(1, -1)
    return wb_t, wg_t, b_fused


# ----------------------------------------------------------------------------
# Tiling / VMEM helpers
# ----------------------------------------------------------------------------
def _round_up(x, m):
    return ((x + m - 1) // m) * m


def _physical_vmem_bytes():
    try:
        return int(pltpu.get_tpu_info().vmem_capacity_bytes)
    except Exception:
        return 64 << 20  # conservative: v7x per-TensorCore VMEM


def _pick_tile_b(batch, dim, act_bytes, out_bytes, budget_bytes):
    if batch <= 16:
        return batch  # full batch (== array dim, no (8,128) divisibility issue)
    if batch <= 128:
        # >= 2 grid steps so megacore (2 TCs on v7x) can shard the batch axis.
        return min(batch, _round_up(pl.cdiv(batch, 2), 8))
    # Large batch: biggest tile whose double-buffered activation/output tiles
    # fit the remaining VMEM budget (small tiles under-utilise HBM bandwidth
    # and pay ~0.35us/step overhead).
    for tb in (512, 384, 256, 128):
        tile_bytes = tb * dim * (2 * 2 * act_bytes + 2 * out_bytes)
        if tile_bytes <= budget_bytes:
            return tb
    return 128


# ----------------------------------------------------------------------------
# Forward wrapper
# ----------------------------------------------------------------------------
def gate_module(bert, gnn, wb_t, wg_t, b_fused):
    """bert, gnn: (B, D).  wb_t, wg_t: (D, D) in (in, out) layout.  b_fused: (1, D) f32."""
    B, D = bert.shape
    assert gnn.shape == (B, D)
    assert wb_t.shape == (D, D) and wg_t.shape == (D, D)
    assert b_fused.shape == (1, D)
    out_dtype = gnn.dtype  # output follows gnn (the gated stream)

    act_bytes = jnp.dtype(bert.dtype).itemsize
    out_bytes = jnp.dtype(out_dtype).itemsize
    w_bytes = jnp.dtype(wb_t.dtype).itemsize
    weight_total = 2 * D * D * w_bytes

    physical_vmem = _physical_vmem_bytes()
    budget = int(physical_vmem * 0.8)

    cost = pl.CostEstimate(
        flops=4 * B * D * D + 4 * B * D,
        transcendentals=B * D,
        bytes_accessed=weight_total + D * 4 + (2 * act_bytes + out_bytes) * B * D,
    )

    def _vmem_limit(vmem_needed):
        # 16 MiB matches v5e's default scoped limit (v6e/v7x default is 32 MiB);
        # only raise when needed and never past ~85% of physical per-core VMEM.
        if vmem_needed <= (16 << 20):
            return None
        return min(int(vmem_needed * 1.25) + (1 << 20), int(physical_vmem * 0.85))

    def _call_resident(single_buffer_weights):
        tile_b = _pick_tile_b(B, D, act_bytes, out_bytes, budget - weight_total)
        n_buf = 1 if single_buffer_weights else 2

        def _w_spec(shape):
            if single_buffer_weights:
                return pl.BlockSpec(shape, lambda i: (0, 0),
                                    pipeline_mode=pl.Buffered(1))
            return pl.BlockSpec(shape, lambda i: (0, 0))

        vmem_needed = (
            n_buf * (weight_total + 8 * D * 4)      # resident weights + bias
            + 2 * 2 * tile_b * D * act_bytes        # bert + gnn tiles (double-buffered)
            + 2 * tile_b * D * out_bytes            # out tile (double-buffered)
            + 3 * tile_b * D * 4                    # f32 z / alpha temps
        )
        return pl.pallas_call(
            gate_kernel_resident,
            out_shape=jax.ShapeDtypeStruct((B, D), out_dtype),
            grid=(pl.cdiv(B, tile_b),),
            in_specs=[
                pl.BlockSpec((tile_b, D), lambda i: (i, 0)),   # bert tile
                pl.BlockSpec((tile_b, D), lambda i: (i, 0)),   # gnn tile
                _w_spec((D, D)),                               # Wb^T (resident)
                _w_spec((D, D)),                               # Wg^T (resident)
                _w_spec((1, D)),                               # fused bias (resident)
            ],
            out_specs=pl.BlockSpec((tile_b, D), lambda i: (i, 0)),
            compiler_params=pltpu.CompilerParams(
                dimension_semantics=("parallel",),
                vmem_limit_bytes=_vmem_limit(vmem_needed),
            ),
            cost_estimate=cost,
        )(bert, gnn, wb_t, wg_t, b_fused)

    def _call_ntiled():
        tile_b = min(_pick_tile_b(B, D, act_bytes, out_bytes, budget // 2), 256)
        tile_n = 128
        for tn in (1024, 512, 256, 128):
            if tn > D:
                continue
            needed = (
                2 * 2 * D * tn * w_bytes                     # two weight tiles, double-buffered
                + 2 * 2 * tile_b * D * act_bytes             # bert + gnn (full K) tiles
                + 2 * tile_b * tn * (act_bytes + out_bytes)  # gnn_n + out tiles
                + 3 * tile_b * tn * 4                        # f32 temps
            )
            if needed <= budget:
                tile_n = tn
                break
        vmem_needed = (
            2 * 2 * D * tile_n * w_bytes
            + 2 * 8 * tile_n * 4
            + 2 * 2 * tile_b * D * act_bytes
            + 2 * tile_b * tile_n * (act_bytes + out_bytes)
            + 3 * tile_b * tile_n * 4
        )
        return pl.pallas_call(
            gate_kernel_ntiled,
            out_shape=jax.ShapeDtypeStruct((B, D), out_dtype),
            grid=(pl.cdiv(B, tile_b), pl.cdiv(D, tile_n)),
            in_specs=[
                pl.BlockSpec((tile_b, D), lambda i, j: (i, 0)),       # bert (full K)
                pl.BlockSpec((tile_b, D), lambda i, j: (i, 0)),       # gnn (full K, matmul LHS)
                pl.BlockSpec((tile_b, tile_n), lambda i, j: (i, j)),  # gnn gating slice
                pl.BlockSpec((D, tile_n), lambda i, j: (0, j)),       # Wb^T N-tile
                pl.BlockSpec((D, tile_n), lambda i, j: (0, j)),       # Wg^T N-tile
                pl.BlockSpec((1, tile_n), lambda i, j: (0, j)),       # bias N-tile
            ],
            out_specs=pl.BlockSpec((tile_b, tile_n), lambda i, j: (i, j)),
            compiler_params=pltpu.CompilerParams(
                dimension_semantics=("parallel", "parallel"),
                vmem_limit_bytes=_vmem_limit(vmem_needed),
            ),
            cost_estimate=cost,
        )(bert, gnn, gnn, wb_t, wg_t, b_fused)

    # Keep the weights fully VMEM-resident when they comfortably fit; otherwise
    # stream them along the feature axis (large D on v7x's 64 MiB VMEM).
    if weight_total <= int(budget * 0.6):
        try:
            return _call_resident(single_buffer_weights=True)
        except Exception:
            # TODO(synk): drop this fallback once pl.Buffered(1) single-buffering
            # is guaranteed on all deployed JAX/Mosaic versions.
            return _call_resident(single_buffer_weights=False)
    return _call_ntiled()


# ----------------------------------------------------------------------------
# Reference & test
# ----------------------------------------------------------------------------
def reference(bert, gnn, wb, bb, wg, bg):
    alpha = jax.nn.sigmoid(bert @ wb.T + bb + gnn @ wg.T + bg)
    return alpha * gnn


if __name__ == "__main__":
    key = jax.random.PRNGKey(0)
    B, D = 8, 128  # batch, dim_model

    k_bert, k_gnn, k_wb, k_bb, k_wg, k_bg = jax.random.split(key, 6)

    bert = jax.random.normal(k_bert, (B, D), dtype=jnp.float32)
    gnn = jax.random.normal(k_gnn, (B, D), dtype=jnp.float32)

    # nn.Linear-style params: weight (D, D) in (out, in) layout, bias (D,).
    bound = 1.0 / (D ** 0.5)
    wb = jax.random.uniform(k_wb, (D, D), minval=-bound, maxval=bound, dtype=jnp.float32)
    bb = jax.random.uniform(k_bb, (D,), minval=-bound, maxval=bound, dtype=jnp.float32)
    wg = jax.random.uniform(k_wg, (D, D), minval=-bound, maxval=bound, dtype=jnp.float32)
    bg = jax.random.uniform(k_bg, (D,), minval=-bound, maxval=bound, dtype=jnp.float32)

    # One-time parameter prep (model-load time). On v6e/v7x pass
    # weight_dtype=jnp.bfloat16 if the model tolerates it (loosen tolerances).
    wb_t, wg_t, b_fused = prepare_gate_params(wb, bb, wg, bg)

    out = gate_module(bert, gnn, wb_t, wg_t, b_fused)
    out = jax.block_until_ready(out)

    ref = reference(bert, gnn, wb, bb, wg, bg)
    assert jnp.allclose(out, ref, atol=1e-5, rtol=1e-5), "mismatch vs reference"

    print("KERNEL_OK")
</pallas_src>

<mosaic_0001>
module attributes {stable_mosaic.version = 11 : i64} {
  func.func @gate_kernel_resident(%arg0: i32, %arg1: memref<8x128xf32, #tpu.memory_space<vmem>>, %arg2: memref<8x128xf32, #tpu.memory_space<vmem>>, %arg3: memref<128x128xf32, #tpu.memory_space<vmem>>, %arg4: memref<128x128xf32, #tpu.memory_space<vmem>>, %arg5: memref<1x128xf32, #tpu.memory_space<vmem>>, %arg6: memref<8x128xf32, #tpu.memory_space<vmem>>) attributes {dimension_semantics = [#tpu.dimension_semantics<parallel>], iteration_bounds = array<i64: 1>, scalar_prefetch = 0 : i64, scratch_operands = 0 : i64, tpu.core_type = #tpu.core_type<tc>, window_params = [{transform_indices = @transform_0, window_bounds = array<i64: 8, 128>}, {transform_indices = @transform_1, window_bounds = array<i64: 8, 128>}, {pipeline_mode = #tpu.pipeline_mode<synchronous>, transform_indices = @transform_2, window_bounds = array<i64: 128, 128>}, {pipeline_mode = #tpu.pipeline_mode<synchronous>, transform_indices = @transform_3, window_bounds = array<i64: 128, 128>}, {pipeline_mode = #tpu.pipeline_mode<synchronous>, transform_indices = @transform_4, window_bounds = array<i64: 1, 128>}, {transform_indices = @transform_5, window_bounds = array<i64: 8, 128>}]} {
    %c0 = arith.constant 0 : index
    %c0_0 = arith.constant 0 : index
    %0 = vector.load %arg2[%c0, %c0_0] : memref<8x128xf32, #tpu.memory_space<vmem>>, vector<8x128xf32>
    %c0_1 = arith.constant 0 : index
    %c0_2 = arith.constant 0 : index
    %1 = vector.load %arg1[%c0_1, %c0_2] : memref<8x128xf32, #tpu.memory_space<vmem>>, vector<8x128xf32>
    %c0_3 = arith.constant 0 : index
    %c0_4 = arith.constant 0 : index
    %2 = vector.load %arg3[%c0_3, %c0_4] : memref<128x128xf32, #tpu.memory_space<vmem>>, vector<128x128xf32>
    %cst = arith.constant dense<0.000000e+00> : vector<8x128xf32>
    %3 = tpu.matmul %1, %2, %cst {dimension_numbers = #tpu.dot_dimension_numbers<[1], [0], [0], [1], [0, 0, 1, 1], [], []>} : vector<8x128xf32>, vector<128x128xf32>, vector<8x128xf32> -> vector<8x128xf32>
    %c0_5 = arith.constant 0 : index
    %c0_6 = arith.constant 0 : index
    %4 = vector.load %arg4[%c0_5, %c0_6] : memref<128x128xf32, #tpu.memory_space<vmem>>, vector<128x128xf32>
    %cst_7 = arith.constant dense<0.000000e+00> : vector<8x128xf32>
    %5 = tpu.matmul %0, %4, %cst_7 {dimension_numbers = #tpu.dot_dimension_numbers<[1], [0], [0], [1], [0, 0, 1, 1], [], []>} : vector<8x128xf32>, vector<128x128xf32>, vector<8x128xf32> -> vector<8x128xf32>
    %6 = arith.addf %3, %5 : vector<8x128xf32>
    %c0_8 = arith.constant 0 : index
    %c0_9 = arith.constant 0 : index
    %7 = vector.load %arg5[%c0_8, %c0_9] : memref<1x128xf32, #tpu.memory_space<vmem>>, vector<1x128xf32>
    %8 = vector.broadcast %7 : vector<1x128xf32> to vector<8x128xf32>
    %9 = arith.addf %6, %8 : vector<8x128xf32>
    %10 = arith.negf %9 : vector<8x128xf32>
    %11 = math.exp %10 : vector<8x128xf32>
    %cst_10 = arith.constant 1.000000e+00 : f32
    %12 = vector.broadcast %cst_10 : f32 to vector<8x128xf32>
    %13 = arith.addf %12, %11 : vector<8x128xf32>
    %14 = arith.divf %12, %13 : vector<8x128xf32>
    %15 = arith.mulf %14, %0 : vector<8x128xf32>
    %c0_11 = arith.constant 0 : index
    %c0_12 = arith.constant 0 : index
    %16 = vector.load %arg6[%c0_11, %c0_12] : memref<8x128xf32, #tpu.memory_space<vmem>>, vector<8x128xf32>
    tpu.vector_store %arg6[%c0_11, %c0_12], %15 {strides = array<i32>} : memref<8x128xf32, #tpu.memory_space<vmem>>, vector<8x128xf32>,
    return
  }
  func.func @transform_0(%arg0: i32) -> (i32, i32) {
    %c0_i32 = arith.constant 0 : i32
    %c0_i32_0 = arith.constant 0 : i32
    return %arg0, %c0_i32 : i32, i32
  }
  func.func @transform_1(%arg0: i32) -> (i32, i32) {
    %c0_i32 = arith.constant 0 : i32
    %c0_i32_0 = arith.constant 0 : i32
    return %arg0, %c0_i32 : i32, i32
  }
  func.func @transform_2(%arg0: i32) -> (i32, i32) {
    %c0_i32 = arith.constant 0 : i32
    %c0_i32_0 = arith.constant 0 : i32
    %c0_i32_1 = arith.constant 0 : i32
    return %c0_i32, %c0_i32_0 : i32, i32
  }
  func.func @transform_3(%arg0: i32) -> (i32, i32) {
    %c0_i32 = arith.constant 0 : i32
    %c0_i32_0 = arith.constant 0 : i32
    %c0_i32_1 = arith.constant 0 : i32
    return %c0_i32, %c0_i32_0 : i32, i32
  }
  func.func @transform_4(%arg0: i32) -> (i32, i32) {
    %c0_i32 = arith.constant 0 : i32
    %c0_i32_0 = arith.constant 0 : i32
    %c0_i32_1 = arith.constant 0 : i32
    return %c0_i32, %c0_i32_0 : i32, i32
  }
  func.func @transform_5(%arg0: i32) -> (i32, i32) {
    %c0_i32 = arith.constant 0 : i32
    %c0_i32_0 = arith.constant 0 : i32
    return %arg0, %c0_i32 : i32, i32
  }
}

module attributes {stable_mosaic.version = 11 : i64} {
  func.func @gate_kernel_resident(%arg0: i32, %arg1: memref<8x128xf32, #tpu.memory_space<vmem>>, %arg2: memref<8x128xf32, #tpu.memory_space<vmem>>, %arg3: memref<128x128xf32, #tpu.memory_space<vmem>>, %arg4: memref<128x128xf32, #tpu.memory_space<vmem>>, %arg5: memref<1x128xf32, #tpu.memory_space<vmem>>, %arg6: memref<8x128xf32, #tpu.memory_space<vmem>>) attributes {dimension_semantics = [#tpu.dimension_semantics<parallel>], iteration_bounds = array<i64: 1>, scalar_prefetch = 0 : i64, scratch_operands = 0 : i64, tpu.core_type = #tpu.core_type<tc>, window_params = [{transform_indices = @transform_0, window_bounds = array<i64: 8, 128>}, {transform_indices = @transform_1, window_bounds = array<i64: 8, 128>}, {pipeline_mode = #tpu.pipeline_mode<synchronous>, transform_indices = @transform_2, window_bounds = array<i64: 128, 128>}, {pipeline_mode = #tpu.pipeline_mode<synchronous>, transform_indices = @transform_3, window_bounds = array<i64: 128, 128>}, {pipeline_mode = #tpu.pipeline_mode<synchronous>, transform_indices = @transform_4, window_bounds = array<i64: 1, 128>}, {transform_indices = @transform_5, window_bounds = array<i64: 8, 128>}]} {
    %c0 = arith.constant 0 : index
    %c0_0 = arith.constant 0 : index
    %0 = vector.load %arg2[%c0, %c0_0] : memref<8x128xf32, #tpu.memory_space<vmem>>, vector<8x128xf32>
    %c0_1 = arith.constant 0 : index
    %c0_2 = arith.constant 0 : index
    %1 = vector.load %arg1[%c0_1, %c0_2] : memref<8x128xf32, #tpu.memory_space<vmem>>, vector<8x128xf32>
    %c0_3 = arith.constant 0 : index
    %c0_4 = arith.constant 0 : index
    %2 = vector.load %arg3[%c0_3, %c0_4] : memref<128x128xf32, #tpu.memory_space<vmem>>, vector<128x128xf32>
    %cst = arith.constant dense<0.000000e+00> : vector<8x128xf32>
    %3 = tpu.matmul %1, %2, %cst {dimension_numbers = #tpu.dot_dimension_numbers<[1], [0], [0], [1], [0, 0, 1, 1], [], []>} : vector<8x128xf32>, vector<128x128xf32>, vector<8x128xf32> -> vector<8x128xf32>
    %c0_5 = arith.constant 0 : index
    %c0_6 = arith.constant 0 : index
    %4 = vector.load %arg4[%c0_5, %c0_6] : memref<128x128xf32, #tpu.memory_space<vmem>>, vector<128x128xf32>
    %cst_7 = arith.constant dense<0.000000e+00> : vector<8x128xf32>
    %5 = tpu.matmul %0, %4, %cst_7 {dimension_numbers = #tpu.dot_dimension_numbers<[1], [0], [0], [1], [0, 0, 1, 1], [], []>} : vector<8x128xf32>, vector<128x128xf32>, vector<8x128xf32> -> vector<8x128xf32>
    %6 = arith.addf %3, %5 : vector<8x128xf32>
    %c0_8 = arith.constant 0 : index
    %c0_9 = arith.constant 0 : index
    %7 = vector.load %arg5[%c0_8, %c0_9] : memref<1x128xf32, #tpu.memory_space<vmem>>, vector<1x128xf32>
    %8 = vector.broadcast %7 : vector<1x128xf32> to vector<8x128xf32>
    %9 = arith.addf %6, %8 : vector<8x128xf32>
    %10 = arith.negf %9 : vector<8x128xf32>
    %11 = math.exp %10 : vector<8x128xf32>
    %cst_10 = arith.constant 1.000000e+00 : f32
    %12 = vector.broadcast %cst_10 : f32 to vector<8x128xf32>
    %13 = arith.addf %12, %11 : vector<8x128xf32>
    %14 = arith.divf %12, %13 : vector<8x128xf32>
    %15 = arith.mulf %14, %0 : vector<8x128xf32>
    %c0_11 = arith.constant 0 : index
    %c0_12 = arith.constant 0 : index
    %16 = vector.load %arg6[%c0_11, %c0_12] : memref<8x128xf32, #tpu.memory_space<vmem>>, vector<8x128xf32>
    tpu.vector_store %arg6[%c0_11, %c0_12], %15 {strides = array<i32>} : memref<8x128xf32, #tpu.memory_space<vmem>>, vector<8x128xf32>,
    return
  }
  func.func @transform_0(%arg0: i32) -> (i32, i32) {
    %c0_i32 = arith.constant 0 : i32
    %c0_i32_0 = arith.constant 0 : i32
    return %arg0, %c0_i32 : i32, i32
  }
  func.func @transform_1(%arg0: i32) -> (i32, i32) {
    %c0_i32 = arith.constant 0 : i32
    %c0_i32_0 = arith.constant 0 : i32
    return %arg0, %c0_i32 : i32, i32
  }
  func.func @transform_2(%arg0: i32) -> (i32, i32) {
    %c0_i32 = arith.constant 0 : i32
    %c0_i32_0 = arith.constant 0 : i32
    %c0_i32_1 = arith.constant 0 : i32
    return %c0_i32, %c0_i32_0 : i32, i32
  }
  func.func @transform_3(%arg0: i32) -> (i32, i32) {
    %c0_i32 = arith.constant 0 : i32
    %c0_i32_0 = arith.constant 0 : i32
    %c0_i32_1 = arith.constant 0 : i32
    return %c0_i32, %c0_i32_0 : i32, i32
  }
  func.func @transform_4(%arg0: i32) -> (i32, i32) {
    %c0_i32 = arith.constant 0 : i32
    %c0_i32_0 = arith.constant 0 : i32
    %c0_i32_1 = arith.constant 0 : i32
    return %c0_i32, %c0_i32_0 : i32, i32
  }
  func.func @transform_5(%arg0: i32) -> (i32, i32) {
    %c0_i32 = arith.constant 0 : i32
    %c0_i32_0 = arith.constant 0 : i32
    return %arg0, %c0_i32 : i32, i32
  }
}

</mosaic_0001>

<bundles_post_ra>
// kernel: tpu_custom_call.1
= control target key start
LH: loop header
LB: loop body
LE: loop exit
PB: predicated region body
PF: predicated region fallthrough
CT: control target
= control target key end

     0   :  { %10 = vsyncpa [#allocation3], 0  ;;  %s684_s0 = inlined_call_operand.hbm [shape: f32[8,128], index: 0, kind: input, shape index: {}]   ;;  %s685_s1 = inlined_call_operand.hbm [shape: f32[8,128], index: 1, kind: input, shape index: {}]   ;;  %s686_s2 = inlined_call_operand.hbm [shape: f32[128,128], index: 2, kind: input, shape index: {}]   ;;  %s687_s3 = inlined_call_operand.hbm [shape: f32[128,128], index: 3, kind: input, shape index: {}]   ;;  %s688_s4 = inlined_call_operand.vmem [shape: f32[1,128], index: 4, kind: input, shape index: {}]   ;;  %s689_s5 = inlined_call_operand.hbm [shape: f32[8,128], index: 5, kind: output, shape index: {}]  }
   0x1   :  { %11 = vsyncpa [#allocation6], 0 }
   0x2   :  { %12 = vsyncpa [#allocation9], 0 }
   0x3   :  { %13 = vsyncpa [#allocation4], 0  ;;  %s565_s18 = smov [#allocation5]   ;;  %s566_s20 = smov [#allocation2]  }
   0x4   :  { %s30_s19 = sshll.u32 %s565_s18, 4  ;;  %s20_s21 = sshll.u32 %s566_s20, 4  ;;  %s31_s19 = int_to_ptr.vmem [resolvable:$true] %s30_s19  ;;  %s21_s21 = int_to_ptr.vmem [resolvable:$true] %s20_s21 }
   0x5   :  { %s447_s24 = scalar_lea.hbm %s685_s1, 128 }
   0x6   :  { %p448_p0 = scmp.ne.s32.totalorder %s685_s1, %s447_s24  ;;  %p451_p1 = scmp.lt.u32.totalorder %s447_s24, %s685_s1 }
   0x8   :  { %p453_p2 = pnand %p451_p1, %p448_p0 }
   0xa   :  { %456 = shalt.err (!%p453_p2)
}
   0xb   :  { %s457_s29 = scalar_lea.vmem %s31_s19, 128  ;;  %p462_p4 = scmp.lt.s32.totalorder %s31_s19, %s31_s19 }
   0xc   :  { %p458_p3 = scmp.ne.s32.totalorder %s31_s19, %s457_s29  ;;  %p463_p5 = scmp.lt.s32.totalorder %s457_s29, %s457_s29 }
   0xe   :  { %p464_p6 = por %p463_p5, %p462_p4 }
  0x10   :  { %p465_p7 = pnand %p464_p6, %p458_p3 }
  0x12   :  { %468 = shalt.err (!%p465_p7)
}
  0x13   :  { %33 = dma.hbm_to_vmem [thread:$0]  %s685_s1, 128, %s31_s19, [#allocation6]  }
  0x14   :  { %s469_s9 = scalar_lea.hbm %s684_s0, 128 }
  0x15   :  { %p470_p8 = scmp.ne.s32.totalorder %s684_s0, %s469_s9  ;;  %p473_p9 = scmp.lt.u32.totalorder %s469_s9, %s684_s0 }
  0x17   :  { %p475_p10 = pnand %p473_p9, %p470_p8 }
  0x19   :  { %478 = shalt.err (!%p475_p10)
}
  0x1a   :  { %s479_s14 = scalar_lea.vmem %s21_s21, 128  ;;  %p484_p12 = scmp.lt.s32.totalorder %s21_s21, %s21_s21 }
  0x1b   :  { %p480_p11 = scmp.ne.s32.totalorder %s21_s21, %s479_s14  ;;  %p485_p13 = scmp.lt.s32.totalorder %s479_s14, %s479_s14 }
  0x1d   :  { %p486_p0 = por %p485_p13, %p484_p12 }
  0x1f   :  { %p487_p1 = pnand %p486_p0, %p480_p11 }
  0x21   :  { %490 = shalt.err (!%p487_p1)
}
  0x22   :  { %23 = dma.hbm_to_vmem [thread:$0]  %s684_s0, 128, %s21_s21, [#allocation3]  }
  0x23   :  { %s567_s16 = smov [#allocation7]   ;;  %s491_s20 = scalar_lea.hbm %s686_s2, 2048 }
  0x24   :  { %s39_s17 = sshll.u32 %s567_s16, 4  ;;  %p492_p2 = scmp.ne.s32.totalorder %s686_s2, %s491_s20  ;;  %s40_s17 = int_to_ptr.vmem [resolvable:$true] %s39_s17 }
  0x25   :  { %p495_p3 = scmp.lt.u32.totalorder %s491_s20, %s686_s2 }
  0x27   :  { %p497_p4 = pnand %p495_p3, %p492_p2 }
  0x29   :  { %500 = shalt.err (!%p497_p4)
}
  0x2a   :  { %s501_s26 = scalar_lea.vmem %s40_s17, 2048  ;;  %p506_p6 = scmp.lt.s32.totalorder %s40_s17, %s40_s17 }
  0x2b   :  { %p502_p5 = scmp.ne.s32.totalorder %s40_s17, %s501_s26  ;;  %p507_p7 = scmp.lt.s32.totalorder %s501_s26, %s501_s26 }
  0x2d   :  { %p508_p8 = por %p507_p7, %p506_p6 }
  0x2f   :  { %p509_p9 = pnand %p508_p8, %p502_p5 }
  0x31   :  { %512 = shalt.err (!%p509_p9)
}
  0x32   :  { %s568_s0 = smov 128   ;;  %s569_s21 = smov 8  }
  0x33   :  { %45 = dma.hbm_to_vmem [thread:$0]  %s686_s2, 2048, %s40_s17, [#allocation6], %s568_s0, %s568_s0, %s569_s21  }
  0x34   :  { %s570_s29 = smov [#allocation8]   ;;  %s513_s8 = scalar_lea.hbm %s687_s3, 2048 }
  0x35   :  { %s51_s30 = sshll.u32 %s570_s29, 4  ;;  %p514_p10 = scmp.ne.s32.totalorder %s687_s3, %s513_s8  ;;  %s52_s30 = int_to_ptr.vmem [resolvable:$true] %s51_s30 }
  0x36   :  { %p517_p11 = scmp.lt.u32.totalorder %s513_s8, %s687_s3 }
  0x38   :  { %p519_p12 = pnand %p517_p11, %p514_p10 }
  0x3a   :  { %522 = shalt.err (!%p519_p12)
}
  0x3b   :  { %s523_s13 = scalar_lea.vmem %s52_s30, 2048  ;;  %p528_p0 = scmp.lt.s32.totalorder %s52_s30, %s52_s30 }
  0x3c   :  { %p524_p13 = scmp.ne.s32.totalorder %s52_s30, %s523_s13  ;;  %p529_p1 = scmp.lt.s32.totalorder %s523_s13, %s523_s13 }
  0x3e   :  { %p530_p2 = por %p529_p1, %p528_p0 }
  0x40   :  { %p531_p3 = pnand %p530_p2, %p524_p13 }
  0x42   :  { %534 = shalt.err (!%p531_p3)
}
  0x43   :  { %57 = dma.hbm_to_vmem [thread:$0]  %s687_s3, 2048, %s52_s30, [#allocation9], %s568_s0, %s568_s0, %s569_s21  }
  0x44   :  { %557 = dma.done.wait [#allocation3], 128  }
  0x45   :  { %558 = vsyncadd [#allocation3], 4294967168 }
  0x46   :  { %559 = dma.done.wait [#allocation6], 2176  }
  0x47   :  { %560 = vsyncadd [#allocation6], 4294965120 }
  0x48   :  { %561 = dma.done.wait [#allocation9], 2048  }
  0x49   :  { %562 = vsyncadd [#allocation9], 4294965248  ;;  %v571_v0 = vmov 0.0|0.0   ;;  %vm572_vm0 = vmmov 0   ;;  %v573_v1 = vmov 0.0   ;;  %v90_v2 = vld [vmem:[#allocation8] sm:$0xff] }
  0x4a   :  { %385 = vmatprep.subr.bf16.mxu0 %v571_v0  ;;  %409 = vmatprep.subr.bf16.mxu1 %v571_v0  ;;  %v91_v3 = vld [vmem:[#allocation8 + $0x8] sm:$0xff]  ;;  %v74_v4 = vld [vmem:[#allocation7] sm:$0xff]  ;;  %v92_v7 = vld [vmem:[#allocation8 + $0x10] sm:$0xff]  ;;  %s574_s15 = smov [#allocation10]  }
  0x4b   :  { %347 = vmatprep.mubr.msk.f32.mxu0 %vm572_vm0, %v573_v1  ;;  %382 = vmatprep.mubr.msk.f32.mxu1 %vm572_vm0, %v573_v1  ;;  %v386_v5 = vpack.c.bf16 %v91_v3, %v90_v2  ;;  %v75_v6 = vld [vmem:[#allocation7 + $0x8] sm:$0xff]  ;;  %v93_v8 = vld [vmem:[#allocation8 + $0x18] sm:$0xff]  ;;  %v76_v10 = vld [vmem:[#allocation7 + $0x10] sm:$0xff]  ;;  %s268_s16 = sshll.u32 %s574_s15, 4  ;;  %s269_s16 = int_to_ptr.vmem [resolvable:$true] %s268_s16 }
  0x4c   :  { %v410_v9 = vpack.c.bf16 %v75_v6, %v74_v4  ;;  %v77_v11 = vld [vmem:[#allocation7 + $0x18] sm:$0xff]  ;;  %v389_v12 = vpack.c.bf16 %v93_v8, %v92_v7  ;;  %v94_v14 = vld [vmem:[#allocation8 + $0x20] sm:$0xff]  ;;  %v95_v15 = vld [vmem:[#allocation8 + $0x28] sm:$0xff]  ;;  %s535_s17 = scalar_lea.vmem %s269_s16, 128  ;;  %p540_p5 = scmp.lt.s32.totalorder %s269_s16, %s269_s16 }
  0x4d   :  { %387 = vmatpush3.bf16.msra.mxu0 %v386_v5  ;;  %v413_v13 = vpack.c.bf16 %v77_v11, %v76_v10  ;;  %v78_v16 = vld [vmem:[#allocation7 + $0x20] sm:$0xff]  ;;  %v79_v17 = vld [vmem:[#allocation7 + $0x28] sm:$0xff]  ;;  %v392_v18 = vpack.c.bf16 %v95_v15, %v94_v14  ;;  %v96_v20 = vld [vmem:[#allocation8 + $0x30] sm:$0xff]  ;;  %p536_p4 = scmp.ne.s32.totalorder %s269_s16, %s535_s17  ;;  %p541_p6 = scmp.lt.s32.totalorder %s535_s17, %s535_s17 }
  0x4e   :  { %411 = vmatpush3.bf16.msra.mxu1 %v410_v9  ;;  %388 = vmatprep.subr.bf16.mxu0 %v571_v0  ;;  %v416_v19 = vpack.c.bf16 %v79_v17, %v78_v16  ;;  %v97_v21 = vld [vmem:[#allocation8 + $0x38] sm:$0xff]  ;;  %v80_v22 = vld [vmem:[#allocation7 + $0x30] sm:$0xff]  ;;  %v98_v26 = vld [vmem:[#allocation8 + $0x40] sm:$0xff] }
  0x4f   :  { %412 = vmatprep.subr.bf16.mxu1 %v571_v0  ;;  %v81_v23 = vld [vmem:[#allocation7 + $0x38] sm:$0xff]  ;;  %v395_v24 = vpack.c.bf16 %v97_v21, %v96_v20  ;;  %v99_v27 = vld [vmem:[#allocation8 + $0x48] sm:$0xff]  ;;  %v82_v28 = vld [vmem:[#allocation7 + $0x40] sm:$0xff]  ;;  %p542_p7 = por %p541_p6, %p540_p5 }
  0x50   :  { %v419_v25 = vpack.c.bf16 %v81_v23, %v80_v22  ;;  %v83_v29 = vld [vmem:[#allocation7 + $0x48] sm:$0xff]  ;;  %v398_v30 = vpack.c.bf16 %v99_v27, %v98_v26  ;;  %v100_v32 = vld [vmem:[#allocation8 + $0x50] sm:$0xff]  ;;  %v101_v33 = vld [vmem:[#allocation8 + $0x58] sm:$0xff] }
  0x51   :  { %390 = vmatpush3.bf16.msra.mxu0 %v389_v12  ;;  %v422_v31 = vpack.c.bf16 %v83_v29, %v82_v28  ;;  %v84_v34 = vld [vmem:[#allocation7 + $0x50] sm:$0xff]  ;;  %v85_v35 = vld [vmem:[#allocation7 + $0x58] sm:$0xff]  ;;  %v401_v36 = vpack.c.bf16 %v101_v33, %v100_v32  ;;  %v102_v38 = vld [vmem:[#allocation8 + $0x60] sm:$0xff]  ;;  %p543_p8 = pnand %p542_p7, %p536_p4 }
  0x52   :  { %414 = vmatpush3.bf16.msra.mxu1 %v413_v13  ;;  %391 = vmatprep.subr.bf16.mxu0 %v571_v0  ;;  %v425_v37 = vpack.c.bf16 %v85_v35, %v84_v34  ;;  %v103_v39 = vld [vmem:[#allocation8 + $0x68] sm:$0xff]  ;;  %v86_v40 = vld [vmem:[#allocation7 + $0x60] sm:$0xff]  ;;  %v104_v44 = vld [vmem:[#allocation8 + $0x70] sm:$0xff] }
  0x53   :  { %415 = vmatprep.subr.bf16.mxu1 %v571_v0  ;;  %v87_v41 = vld [vmem:[#allocation7 + $0x68] sm:$0xff]  ;;  %v404_v42 = vpack.c.bf16 %v103_v39, %v102_v38  ;;  %v105_v45 = vld [vmem:[#allocation8 + $0x78] sm:$0xff]  ;;  %v88_v46 = vld [vmem:[#allocation7 + $0x70] sm:$0xff] }
  0x54   :  { %v428_v43 = vpack.c.bf16 %v87_v41, %v86_v40  ;;  %v89_v47 = vld [vmem:[#allocation7 + $0x78] sm:$0xff]  ;;  %v407_v48 = vpack.c.bf16 %v105_v45, %v104_v44  ;;  %v73_v51 = vld [vmem:[#allocation2] sm:$0xff] }
  0x55   :  { %393 = vmatpush3.bf16.msra.mxu0 %v392_v18  ;;  %v431_v49 = vpack.c.bf16 %v89_v47, %v88_v46  ;;  %v72_v50 = vld [vmem:[#allocation5] sm:$0xff]  ;;  %v279_v54 = vld [vmem:[%s688_s4] ss:$0 sm:$0xff] }
  0x56   :  { %417 = vmatpush3.bf16.msra.mxu1 %v416_v19  ;;  %394 = vmatprep.subr.bf16.mxu0 %v571_v0 }
  0x57   :  { %418 = vmatprep.subr.bf16.mxu1 %v571_v0 }
  0x59   :  { %396 = vmatpush3.bf16.msra.mxu0 %v395_v24 }
  0x5a   :  { %420 = vmatpush3.bf16.msra.mxu1 %v419_v25  ;;  %397 = vmatprep.subr.bf16.mxu0 %v571_v0 }
  0x5b   :  { %421 = vmatprep.subr.bf16.mxu1 %v571_v0 }
  0x5d   :  { %399 = vmatpush3.bf16.msra.mxu0 %v398_v30 }
  0x5e   :  { %423 = vmatpush3.bf16.msra.mxu1 %v422_v31  ;;  %400 = vmatprep.subr.bf16.mxu0 %v571_v0 }
  0x5f   :  { %424 = vmatprep.subr.bf16.mxu1 %v571_v0 }
  0x61   :  { %402 = vmatpush3.bf16.msra.mxu0 %v401_v36 }
  0x62   :  { %426 = vmatpush3.bf16.msra.mxu1 %v425_v37  ;;  %403 = vmatprep.subr.bf16.mxu0 %v571_v0 }
  0x63   :  { %427 = vmatprep.subr.bf16.mxu1 %v571_v0 }
  0x65   :  { %405 = vmatpush3.bf16.msra.mxu0 %v404_v42 }
  0x66   :  { %429 = vmatpush3.bf16.msra.mxu1 %v428_v43  ;;  %406 = vmatprep.subr.bf16.mxu0 %v571_v0 }
  0x67   :  { %430 = vmatprep.subr.bf16.mxu1 %v571_v0 }
  0x69   :  { %408 = vmatpush3.bf16.msra.mxu0 %v407_v48 }
  0x6a   :  { %432 = vmatpush3.bf16.msra.mxu1 %v431_v49 }
  0x6c   :  { %348 = vmatmul.mubr.f32.vlgmr.msra.gmra.mrb[0].mxu0 %v72_v50 }
  0x6d   :  { %383 = vmatmul.mubr.f32.vlgmr.msra.gmra.mrb[0].mxu1 %v73_v51 }
 0x13f   :  { %v172_v52 = vpop.f32.mrb[0].mxu0 }
 0x140   :  { %v242_v53 = vpop.f32.mrb[0].mxu1  ;;  %v349_v55 = vpop.f32.mrb[1].mxu0 }
 0x141   :  { %v243_v56 = vadd.f32 %v242_v53, %v172_v52  ;;  %v384_v57 = vpop.f32.mrb[1].mxu1 }
 0x143   :  { %v253_v58 = vadd.f32 %v279_v54, %v243_v56 }
 0x145   :  { %v280_v59 = vmul.f32 -1.442695, %v253_v58 }
 0x147   :  { %443 = vpow2.f32 %v280_v59 }
 0x151   :  { %v444_v60 = vpop.eup %443 }
 0x152   :  { %v257_v61 = vadd.f32 1.0, %v444_v60 }
 0x154   :  { %445 = vrcp.f32 %v257_v61 }
 0x15e   :  { %v446_v62 = vpop.eup %445 }
 0x15f   :  { %v260_v63 = vmul.f32 %v446_v62, %v72_v50 }
 0x161   :  { %261 = vst [vmem:[#allocation10] sm:$0xff] %v260_v63 }
 0x162   :  { %546 = shalt.err (!%p543_p8)
}
 0x163   :  { %s547_s19 = scalar_lea.hbm %s689_s5, 128 }
 0x164   :  { %p548_p9 = scmp.ne.s32.totalorder %s689_s5, %s547_s19  ;;  %p551_p10 = scmp.lt.u32.totalorder %s547_s19, %s689_s5 }
 0x166   :  { %p553_p11 = pnand %p551_p10, %p548_p9 }
 0x168   :  { %556 = shalt.err (!%p553_p11)
}
 0x169   :  { %271 = dma.vmem_to_hbm [thread:$0]  %s269_s16, 128, %s689_s5, [#allocation4]  }
 0x16a   :  { %563 = dma.done.wait [#allocation4], 128  }
 0x16b   :  { %564 = vsyncadd [#allocation4], 4294967168 }
 0x16c   :  { %275 = vsyncpa [#allocation3], 1 }
 0x16d   :  { %276 = vsyncpa [#allocation6], 1 }
 0x16e   :  { %277 = vsyncpa [#allocation9], 1 }
 0x16f   :  { %278 = vsyncpa [#allocation4], 1 }

// kernel: tpu_custom_call.1
= control target key start
LH: loop header
LB: loop body
LE: loop exit
PB: predicated region body
PF: predicated region fallthrough
CT: control target
= control target key end

     0   :  { %10 = vsyncpa [#allocation3], 0  ;;  %s684_s0 = inlined_call_operand.hbm [shape: f32[8,128], index: 0, kind: input, shape index: {}]   ;;  %s685_s1 = inlined_call_operand.hbm [shape: f32[8,128], index: 1, kind: input, shape index: {}]   ;;  %s686_s2 = inlined_call_operand.hbm [shape: f32[128,128], index: 2, kind: input, shape index: {}]   ;;  %s687_s3 = inlined_call_operand.hbm [shape: f32[128,128], index: 3, kind: input, shape index: {}]   ;;  %s688_s4 = inlined_call_operand.vmem [shape: f32[1,128], index: 4, kind: input, shape index: {}]   ;;  %s689_s5 = inlined_call_operand.hbm [shape: f32[8,128], index: 5, kind: output, shape index: {}]  }
   0x1   :  { %11 = vsyncpa [#allocation6], 0 }
   0x2   :  { %12 = vsyncpa [#allocation9], 0 }
   0x3   :  { %13 = vsyncpa [#allocation4], 0  ;;  %s565_s18 = smov [#allocation5]   ;;  %s566_s20 = smov [#allocation2]  }
   0x4   :  { %s30_s19 = sshll.u32 %s565_s18, 4  ;;  %s20_s21 = sshll.u32 %s566_s20, 4  ;;  %s31_s19 = int_to_ptr.vmem [resolvable:$true] %s30_s19  ;;  %s21_s21 = int_to_ptr.vmem [resolvable:$true] %s20_s21 }
   0x5   :  { %s447_s24 = scalar_lea.hbm %s685_s1, 128 }
   0x6   :  { %p448_p0 = scmp.ne.s32.totalorder %s685_s1, %s447_s24  ;;  %p451_p1 = scmp.lt.u32.totalorder %s447_s24, %s685_s1 }
   0x8   :  { %p453_p2 = pnand %p451_p1, %p448_p0 }
   0xa   :  { %456 = shalt.err (!%p453_p2)
}
   0xb   :  { %s457_s29 = scalar_lea.vmem %s31_s19, 128  ;;  %p462_p4 = scmp.lt.s32.totalorder %s31_s19, %s31_s19 }
   0xc   :  { %p458_p3 = scmp.ne.s32.totalorder %s31_s19, %s457_s29  ;;  %p463_p5 = scmp.lt.s32.totalorder %s457_s29, %s457_s29 }
   0xe   :  { %p464_p6 = por %p463_p5, %p462_p4 }
  0x10   :  { %p465_p7 = pnand %p464_p6, %p458_p3 }
  0x12   :  { %468 = shalt.err (!%p465_p7)
}
  0x13   :  { %33 = dma.hbm_to_vmem [thread:$0]  %s685_s1, 128, %s31_s19, [#allocation6]  }
  0x14   :  { %s469_s9 = scalar_lea.hbm %s684_s0, 128 }
  0x15   :  { %p470_p8 = scmp.ne.s32.totalorder %s684_s0, %s469_s9  ;;  %p473_p9 = scmp.lt.u32.totalorder %s469_s9, %s684_s0 }
  0x17   :  { %p475_p10 = pnand %p473_p9, %p470_p8 }
  0x19   :  { %478 = shalt.err (!%p475_p10)
}
  0x1a   :  { %s479_s14 = scalar_lea.vmem %s21_s21, 128  ;;  %p484_p12 = scmp.lt.s32.totalorder %s21_s21, %s21_s21 }
  0x1b   :  { %p480_p11 = scmp.ne.s32.totalorder %s21_s21, %s479_s14  ;;  %p485_p13 = scmp.lt.s32.totalorder %s479_s14, %s479_s14 }
  0x1d   :  { %p486_p0 = por %p485_p13, %p484_p12 }
  0x1f   :  { %p487_p1 = pnand %p486_p0, %p480_p11 }
  0x21   :  { %490 = shalt.err (!%p487_p1)
}
  0x22   :  { %23 = dma.hbm_to_vmem [thread:$0]  %s684_s0, 128, %s21_s21, [#allocation3]  }
  0x23   :  { %s567_s16 = smov [#allocation7]   ;;  %s491_s20 = scalar_lea.hbm %s686_s2, 2048 }
  0x24   :  { %s39_s17 = sshll.u32 %s567_s16, 4  ;;  %p492_p2 = scmp.ne.s32.totalorder %s686_s2, %s491_s20  ;;  %s40_s17 = int_to_ptr.vmem [resolvable:$true] %s39_s17 }
  0x25   :  { %p495_p3 = scmp.lt.u32.totalorder %s491_s20, %s686_s2 }
  0x27   :  { %p497_p4 = pnand %p495_p3, %p492_p2 }
  0x29   :  { %500 = shalt.err (!%p497_p4)
}
  0x2a   :  { %s501_s26 = scalar_lea.vmem %s40_s17, 2048  ;;  %p506_p6 = scmp.lt.s32.totalorder %s40_s17, %s40_s17 }
  0x2b   :  { %p502_p5 = scmp.ne.s32.totalorder %s40_s17, %s501_s26  ;;  %p507_p7 = scmp.lt.s32.totalorder %s501_s26, %s501_s26 }
  0x2d   :  { %p508_p8 = por %p507_p7, %p506_p6 }
  0x2f   :  { %p509_p9 = pnand %p508_p8, %p502_p5 }
  0x31   :  { %512 = shalt.err (!%p509_p9)
}
  0x32   :  { %s568_s0 = smov 128   ;;  %s569_s21 = smov 8  }
  0x33   :  { %45 = dma.hbm_to_vmem [thread:$0]  %s686_s2, 2048, %s40_s17, [#allocation6], %s568_s0, %s568_s0, %s569_s21  }
  0x34   :  { %s570_s29 = smov [#allocation8]   ;;  %s513_s8 = scalar_lea.hbm %s687_s3, 2048 }
  0x35   :  { %s51_s30 = sshll.u32 %s570_s29, 4  ;;  %p514_p10 = scmp.ne.s32.totalorder %s687_s3, %s513_s8  ;;  %s52_s30 = int_to_ptr.vmem [resolvable:$true] %s51_s30 }
  0x36   :  { %p517_p11 = scmp.lt.u32.totalorder %s513_s8, %s687_s3 }
  0x38   :  { %p519_p12 = pnand %p517_p11, %p514_p10 }
  0x3a   :  { %522 = shalt.err (!%p519_p12)
}
  0x3b   :  { %s523_s13 = scalar_lea.vmem %s52_s30, 2048  ;;  %p528_p0 = scmp.lt.s32.totalorder %s52_s30, %s52_s30 }
  0x3c   :  { %p524_p13 = scmp.ne.s32.totalorder %s52_s30, %s523_s13  ;;  %p529_p1 = scmp.lt.s32.totalorder %s523_s13, %s523_s13 }
  0x3e   :  { %p530_p2 = por %p529_p1, %p528_p0 }
  0x40   :  { %p531_p3 = pnand %p530_p2, %p524_p13 }
  0x42   :  { %534 = shalt.err (!%p531_p3)
}
  0x43   :  { %57 = dma.hbm_to_vmem [thread:$0]  %s687_s3, 2048, %s52_s30, [#allocation9], %s568_s0, %s568_s0, %s569_s21  }
  0x44   :  { %557 = dma.done.wait [#allocation3], 128  }
  0x45   :  { %558 = vsyncadd [#allocation3], 4294967168 }
  0x46   :  { %559 = dma.done.wait [#allocation6], 2176  }
  0x47   :  { %560 = vsyncadd [#allocation6], 4294965120 }
  0x48   :  { %561 = dma.done.wait [#allocation9], 2048  }
  0x49   :  { %562 = vsyncadd [#allocation9], 4294965248  ;;  %v571_v0 = vmov 0.0|0.0   ;;  %vm572_vm0 = vmmov 0   ;;  %v573_v1 = vmov 0.0   ;;  %v90_v2 = vld [vmem:[#allocation8] sm:$0xff] }
  0x4a   :  { %385 = vmatprep.subr.bf16.mxu0 %v571_v0  ;;  %409 = vmatprep.subr.bf16.mxu1 %v571_v0  ;;  %v91_v3 = vld [vmem:[#allocation8 + $0x8] sm:$0xff]  ;;  %v74_v4 = vld [vmem:[#allocation7] sm:$0xff]  ;;  %v92_v7 = vld [vmem:[#allocation8 + $0x10] sm:$0xff]  ;;  %s574_s15 = smov [#allocation10]  }
  0x4b   :  { %347 = vmatprep.mubr.msk.f32.mxu0 %vm572_vm0, %v573_v1  ;;  %382 = vmatprep.mubr.msk.f32.mxu1 %vm572_vm0, %v573_v1  ;;  %v386_v5 = vpack.c.bf16 %v91_v3, %v90_v2  ;;  %v75_v6 = vld [vmem:[#allocation7 + $0x8] sm:$0xff]  ;;  %v93_v8 = vld [vmem:[#allocation8 + $0x18] sm:$0xff]  ;;  %v76_v10 = vld [vmem:[#allocation7 + $0x10] sm:$0xff]  ;;  %s268_s16 = sshll.u32 %s574_s15, 4  ;;  %s269_s16 = int_to_ptr.vmem [resolvable:$true] %s268_s16 }
  0x4c   :  { %v410_v9 = vpack.c.bf16 %v75_v6, %v74_v4  ;;  %v77_v11 = vld [vmem:[#allocation7 + $0x18] sm:$0xff]  ;;  %v389_v12 = vpack.c.bf16 %v93_v8, %v92_v7  ;;  %v94_v14 = vld [vmem:[#allocation8 + $0x20] sm:$0xff]  ;;  %v95_v15 = vld [vmem:[#allocation8 + $0x28] sm:$0xff]  ;;  %s535_s17 = scalar_lea.vmem %s269_s16, 128  ;;  %p540_p5 = scmp.lt.s32.totalorder %s269_s16, %s269_s16 }
  0x4d   :  { %387 = vmatpush3.bf16.msra.mxu0 %v386_v5  ;;  %v413_v13 = vpack.c.bf16 %v77_v11, %v76_v10  ;;  %v78_v16 = vld [vmem:[#allocation7 + $0x20] sm:$0xff]  ;;  %v79_v17 = vld [vmem:[#allocation7 + $0x28] sm:$0xff]  ;;  %v392_v18 = vpack.c.bf16 %v95_v15, %v94_v14  ;;  %v96_v20 = vld [vmem:[#allocation8 + $0x30] sm:$0xff]  ;;  %p536_p4 = scmp.ne.s32.totalorder %s269_s16, %s535_s17  ;;  %p541_p6 = scmp.lt.s32.totalorder %s535_s17, %s535_s17 }
  0x4e   :  { %411 = vmatpush3.bf16.msra.mxu1 %v410_v9  ;;  %388 = vmatprep.subr.bf16.mxu0 %v571_v0  ;;  %v416_v19 = vpack.c.bf16 %v79_v17, %v78_v16  ;;  %v97_v21 = vld [vmem:[#allocation8 + $0x38] sm:$0xff]  ;;  %v80_v22 = vld [vmem:[#allocation7 + $0x30] sm:$0xff]  ;;  %v98_v26 = vld [vmem:[#allocation8 + $0x40] sm:$0xff] }
  0x4f   :  { %412 = vmatprep.subr.bf16.mxu1 %v571_v0  ;;  %v81_v23 = vld [vmem:[#allocation7 + $0x38] sm:$0xff]  ;;  %v395_v24 = vpack.c.bf16 %v97_v21, %v96_v20  ;;  %v99_v27 = vld [vmem:[#allocation8 + $0x48] sm:$0xff]  ;;  %v82_v28 = vld [vmem:[#allocation7 + $0x40] sm:$0xff]  ;;  %p542_p7 = por %p541_p6, %p540_p5 }
  0x50   :  { %v419_v25 = vpack.c.bf16 %v81_v23, %v80_v22  ;;  %v83_v29 = vld [vmem:[#allocation7 + $0x48] sm:$0xff]  ;;  %v398_v30 = vpack.c.bf16 %v99_v27, %v98_v26  ;;  %v100_v32 = vld [vmem:[#allocation8 + $0x50] sm:$0xff]  ;;  %v101_v33 = vld [vmem:[#allocation8 + $0x58] sm:$0xff] }
  0x51   :  { %390 = vmatpush3.bf16.msra.mxu0 %v389_v12  ;;  %v422_v31 = vpack.c.bf16 %v83_v29, %v82_v28  ;;  %v84_v34 = vld [vmem:[#allocation7 + $0x50] sm:$0xff]  ;;  %v85_v35 = vld [vmem:[#allocation7 + $0x58] sm:$0xff]  ;;  %v401_v36 = vpack.c.bf16 %v101_v33, %v100_v32  ;;  %v102_v38 = vld [vmem:[#allocation8 + $0x60] sm:$0xff]  ;;  %p543_p8 = pnand %p542_p7, %p536_p4 }
  0x52   :  { %414 = vmatpush3.bf16.msra.mxu1 %v413_v13  ;;  %391 = vmatprep.subr.bf16.mxu0 %v571_v0  ;;  %v425_v37 = vpack.c.bf16 %v85_v35, %v84_v34  ;;  %v103_v39 = vld [vmem:[#allocation8 + $0x68] sm:$0xff]  ;;  %v86_v40 = vld [vmem:[#allocation7 + $0x60] sm:$0xff]  ;;  %v104_v44 = vld [vmem:[#allocation8 + $0x70] sm:$0xff] }
  0x53   :  { %415 = vmatprep.subr.bf16.mxu1 %v571_v0  ;;  %v87_v41 = vld [vmem:[#allocation7 + $0x68] sm:$0xff]  ;;  %v404_v42 = vpack.c.bf16 %v103_v39, %v102_v38  ;;  %v105_v45 = vld [vmem:[#allocation8 + $0x78] sm:$0xff]  ;;  %v88_v46 = vld [vmem:[#allocation7 + $0x70] sm:$0xff] }
  0x54   :  { %v428_v43 = vpack.c.bf16 %v87_v41, %v86_v40  ;;  %v89_v47 = vld [vmem:[#allocation7 + $0x78] sm:$0xff]  ;;  %v407_v48 = vpack.c.bf16 %v105_v45, %v104_v44  ;;  %v73_v51 = vld [vmem:[#allocation2] sm:$0xff] }
  0x55   :  { %393 = vmatpush3.bf16.msra.mxu0 %v392_v18  ;;  %v431_v49 = vpack.c.bf16 %v89_v47, %v88_v46  ;;  %v72_v50 = vld [vmem:[#allocation5] sm:$0xff]  ;;  %v279_v54 = vld [vmem:[%s688_s4] ss:$0 sm:$0xff] }
  0x56   :  { %417 = vmatpush3.bf16.msra.mxu1 %v416_v19  ;;  %394 = vmatprep.subr.bf16.mxu0 %v571_v0 }
  0x57   :  { %418 = vmatprep.subr.bf16.mxu1 %v571_v0 }
  0x59   :  { %396 = vmatpush3.bf16.msra.mxu0 %v395_v24 }
  0x5a   :  { %420 = vmatpush3.bf16.msra.mxu1 %v419_v25  ;;  %397 = vmatprep.subr.bf16.mxu0 %v571_v0 }
  0x5b   :  { %421 = vmatprep.subr.bf16.mxu1 %v571_v0 }
  0x5d   :  { %399 = vmatpush3.bf16.msra.mxu0 %v398_v30 }
  0x5e   :  { %423 = vmatpush3.bf16.msra.mxu1 %v422_v31  ;;  %400 = vmatprep.subr.bf16.mxu0 %v571_v0 }
  0x5f   :  { %424 = vmatprep.subr.bf16.mxu1 %v571_v0 }
  0x61   :  { %402 = vmatpush3.bf16.msra.mxu0 %v401_v36 }
  0x62   :  { %426 = vmatpush3.bf16.msra.mxu1 %v425_v37  ;;  %403 = vmatprep.subr.bf16.mxu0 %v571_v0 }
  0x63   :  { %427 = vmatprep.subr.bf16.mxu1 %v571_v0 }
  0x65   :  { %405 = vmatpush3.bf16.msra.mxu0 %v404_v42 }
  0x66   :  { %429 = vmatpush3.bf16.msra.mxu1 %v428_v43  ;;  %406 = vmatprep.subr.bf16.mxu0 %v571_v0 }
  0x67   :  { %430 = vmatprep.subr.bf16.mxu1 %v571_v0 }
  0x69   :  { %408 = vmatpush3.bf16.msra.mxu0 %v407_v48 }
  0x6a   :  { %432 = vmatpush3.bf16.msra.mxu1 %v431_v49 }
  0x6c   :  { %348 = vmatmul.mubr.f32.vlgmr.msra.gmra.mrb[0].mxu0 %v72_v50 }
  0x6d   :  { %383 = vmatmul.mubr.f32.vlgmr.msra.gmra.mrb[0].mxu1 %v73_v51 }
 0x13f   :  { %v172_v52 = vpop.f32.mrb[0].mxu0 }
 0x140   :  { %v242_v53 = vpop.f32.mrb[0].mxu1  ;;  %v349_v55 = vpop.f32.mrb[1].mxu0 }
 0x141   :  { %v243_v56 = vadd.f32 %v242_v53, %v172_v52  ;;  %v384_v57 = vpop.f32.mrb[1].mxu1 }
 0x143   :  { %v253_v58 = vadd.f32 %v279_v54, %v243_v56 }
 0x145   :  { %v280_v59 = vmul.f32 -1.442695, %v253_v58 }
 0x147   :  { %443 = vpow2.f32 %v280_v59 }
 0x151   :  { %v444_v60 = vpop.eup %443 }
 0x152   :  { %v257_v61 = vadd.f32 1.0, %v444_v60 }
 0x154   :  { %445 = vrcp.f32 %v257_v61 }
 0x15e   :  { %v446_v62 = vpop.eup %445 }
 0x15f   :  { %v260_v63 = vmul.f32 %v446_v62, %v72_v50 }
 0x161   :  { %261 = vst [vmem:[#allocation10] sm:$0xff] %v260_v63 }
 0x162   :  { %546 = shalt.err (!%p543_p8)
}
 0x163   :  { %s547_s19 = scalar_lea.hbm %s689_s5, 128 }
 0x164   :  { %p548_p9 = scmp.ne.s32.totalorder %s689_s5, %s547_s19  ;;  %p551_p10 = scmp.lt.u32.totalorder %s547_s19, %s689_s5 }
 0x166   :  { %p553_p11 = pnand %p551_p10, %p548_p9 }
 0x168   :  { %556 = shalt.err (!%p553_p11)
}
 0x169   :  { %271 = dma.vmem_to_hbm [thread:$0]  %s269_s16, 128, %s689_s5, [#allocation4]  }
 0x16a   :  { %563 = dma.done.wait [#allocation4], 128  }
 0x16b   :  { %564 = vsyncadd [#allocation4], 4294967168 }
 0x16c   :  { %275 = vsyncpa [#allocation3], 1 }
 0x16d   :  { %276 = vsyncpa [#allocation6], 1 }
 0x16e   :  { %277 = vsyncpa [#allocation9], 1 }
 0x16f   :  { %278 = vsyncpa [#allocation4], 1 }

</bundles_post_ra>
